<compile_context>
chip_gen: v6e
topology: v6e:2x2x1
jax: 0.10.0
libtpu: 0.0.40
codegen_flags: <defaults>
</compile_context>

<pallas_src>
import functools

import jax
import jax.numpy as jnp
from jax.experimental import pallas as pl
from jax.experimental.pallas import tpu as pltpu

LANE = 128      # TPU lane width; output columns padded to a multiple of this
HIDDEN = 128    # fixed by the PGN module


def pgn_kernel(x_ref, w1_ref, b1_ref, w2_ref, b2_ref, o_ref):
    # Hidden layer: x @ W1 on the MXU with f32 accumulation.
    h = jnp.dot(x_ref[...], w1_ref[...], preferred_element_type=jnp.float32)
    # Bias + ReLU in f32 on the VPU (b1 is (1, hidden), broadcasts over rows).
    h = jnp.maximum(h + b1_ref[...], 0.0)
    # Match the second matmul's operand dtype (bf16 -> single-pass MXU when enabled).
    h = h.astype(w2_ref.dtype)
    # Output layer: h @ W2_padded + b2_padded -> lane-dense (rows, 128) store.
    out = jnp.dot(h, w2_ref[...], preferred_element_type=jnp.float32)
    o_ref[...] = (out + b2_ref[...]).astype(o_ref.dtype)


@functools.partial(jax.jit, static_argnames=("n_actions", "batch_block"))
def pgn_forward(x, w1, b1, w2p, b2p, *, n_actions, batch_block=256):
    """x: (B, input_size). w2p/b2p are already zero-padded to a multiple of 128 cols."""
    B, in_f = x.shape
    hidden = w1.shape[1]
    out_pad = w2p.shape[1]

    # MXU operand dtype follows the weights (f32 or bf16); biases stay f32.
    x = x.astype(w1.dtype)

    if B <= batch_block:
        # Small batch: single invocation, no grid / pipeline overhead; every
        # operand is a full-array VMEM block.
        out = pl.pallas_call(
            pgn_kernel,
            out_shape=jax.ShapeDtypeStruct((B, out_pad), jnp.float32),
            in_specs=[pl.BlockSpec(memory_space=pltpu.MemorySpace.VMEM)] * 5,
            out_specs=pl.BlockSpec(memory_space=pltpu.MemorySpace.VMEM),
        )(x, w1, b1, w2p, b2p)
    else:
        # Large batch: stream rows in batch_block chunks; weights stay resident
        # across the grid; batch axis marked "parallel" (v7x megacore sharding).
        n_blk = pl.cdiv(B, batch_block)
        Bp = n_blk * batch_block
        if Bp != B:
            x = jnp.pad(x, ((0, Bp - B), (0, 0)))
        out = pl.pallas_call(
            pgn_kernel,
            out_shape=jax.ShapeDtypeStruct((Bp, out_pad), jnp.float32),
            grid=(n_blk,),
            in_specs=[
                pl.BlockSpec((batch_block, in_f), lambda i: (i, 0)),
                pl.BlockSpec((in_f, hidden), lambda i: (0, 0)),
                pl.BlockSpec((1, hidden), lambda i: (0, 0)),
                pl.BlockSpec((hidden, out_pad), lambda i: (0, 0)),
                pl.BlockSpec((1, out_pad), lambda i: (0, 0)),
            ],
            out_specs=pl.BlockSpec((batch_block, out_pad), lambda i: (i, 0)),
            compiler_params=pltpu.CompilerParams(
                dimension_semantics=("parallel",),
            ),
        )(x, w1, b1, w2p, b2p)
        out = out[:B]

    # Slice the zero-padded columns back off (free layout plumbing).
    return out[:, :n_actions]


def init_params(key, input_size, n_actions, hidden=HIDDEN):
    """PyTorch nn.Linear default init: U(-1/sqrt(fan_in), 1/sqrt(fan_in))."""
    k1, k2, k3, k4 = jax.random.split(key, 4)
    bound1 = 1.0 / float(jnp.sqrt(jnp.float32(input_size)))
    bound2 = 1.0 / float(jnp.sqrt(jnp.float32(hidden)))
    w1 = jax.random.uniform(k1, (input_size, hidden), jnp.float32, -bound1, bound1)
    b1 = jax.random.uniform(k2, (1, hidden), jnp.float32, -bound1, bound1)
    w2 = jax.random.uniform(k3, (hidden, n_actions), jnp.float32, -bound2, bound2)
    b2 = jax.random.uniform(k4, (1, n_actions), jnp.float32, -bound2, bound2)
    return w1, b1, w2, b2


def pad_output_params(w2, b2, lane=LANE):
    """Zero-pad output-projection columns to a lane-dense multiple of 128 (done once)."""
    n_actions = w2.shape[1]
    out_pad = max(lane, ((n_actions + lane - 1) // lane) * lane)
    w2p = jnp.pad(w2, ((0, 0), (0, out_pad - n_actions)))
    b2p = jnp.pad(b2, ((0, 0), (0, out_pad - n_actions)))
    return w2p, b2p


if __name__ == "__main__":
    key = jax.random.PRNGKey(0)
    kx1, kx2, kp = jax.random.split(key, 3)

    input_size = 32
    n_actions = 6
    hidden = HIDDEN

    w1, b1, w2, b2 = init_params(kp, input_size, n_actions, hidden)
    w2p, b2p = pad_output_params(w2, b2)

    def reference(x):
        return jnp.maximum(x @ w1 + b1, 0.0) @ w2 + b2

    # --- small batch (no-grid path), f32 ---
    x_small = jax.random.normal(kx1, (16, input_size), jnp.float32)
    out_small = jax.block_until_ready(
        pgn_forward(x_small, w1, b1, w2p, b2p, n_actions=n_actions))
    assert out_small.shape == (16, n_actions)
    assert jnp.allclose(out_small, reference(x_small), atol=1e-5, rtol=1e-5)

    # --- larger batch (batch-tiled "parallel" grid path, weights resident), f32 ---
    x_big = jax.random.normal(kx2, (512, input_size), jnp.float32)
    out_big = jax.block_until_ready(
        pgn_forward(x_big, w1, b1, w2p, b2p, n_actions=n_actions, batch_block=256))
    assert out_big.shape == (512, n_actions)
    assert jnp.allclose(out_big, reference(x_big), atol=1e-5, rtol=1e-5)

    # --- bf16 MXU operands (v6e/v7x win); bias/ReLU/accumulation stay f32 ---
    w1_bf = w1.astype(jnp.bfloat16)
    w2p_bf = w2p.astype(jnp.bfloat16)
    out_bf = jax.block_until_ready(
        pgn_forward(x_big, w1_bf, b1, w2p_bf, b2p, n_actions=n_actions, batch_block=256))
    assert out_bf.shape == (512, n_actions)
    assert jnp.allclose(out_bf, reference(x_big), atol=5e-2, rtol=5e-2)

    print("KERNEL_OK")
</pallas_src>

<mosaic_0001>
module attributes {stable_mosaic.version = 11 : i64} {
  func.func @pgn_kernel(%arg0: memref<16x32xf32, #tpu.memory_space<vmem>>, %arg1: memref<32x128xf32, #tpu.memory_space<vmem>>, %arg2: memref<1x128xf32, #tpu.memory_space<vmem>>, %arg3: memref<128x128xf32, #tpu.memory_space<vmem>>, %arg4: memref<1x128xf32, #tpu.memory_space<vmem>>, %arg5: memref<16x128xf32, #tpu.memory_space<vmem>>) attributes {dimension_semantics = [], scalar_prefetch = 0 : i64, scratch_operands = 0 : i64, tpu.core_type = #tpu.core_type<tc>} {
    %c0 = arith.constant 0 : index
    %c0_0 = arith.constant 0 : index
    %0 = vector.load %arg0[%c0, %c0_0] : memref<16x32xf32, #tpu.memory_space<vmem>>, vector<16x32xf32>
    %c0_1 = arith.constant 0 : index
    %c0_2 = arith.constant 0 : index
    %1 = vector.load %arg1[%c0_1, %c0_2] : memref<32x128xf32, #tpu.memory_space<vmem>>, vector<32x128xf32>
    %cst = arith.constant dense<0.000000e+00> : vector<16x128xf32>
    %2 = tpu.matmul %0, %1, %cst {dimension_numbers = #tpu.dot_dimension_numbers<[1], [0], [0], [1], [0, 0, 1, 1], [], []>} : vector<16x32xf32>, vector<32x128xf32>, vector<16x128xf32> -> vector<16x128xf32>
    %c0_3 = arith.constant 0 : index
    %c0_4 = arith.constant 0 : index
    %3 = vector.load %arg2[%c0_3, %c0_4] : memref<1x128xf32, #tpu.memory_space<vmem>>, vector<1x128xf32>
    %4 = vector.broadcast %3 : vector<1x128xf32> to vector<16x128xf32>
    %5 = arith.addf %2, %4 : vector<16x128xf32>
    %cst_5 = arith.constant 0.000000e+00 : f32
    %6 = vector.broadcast %cst_5 : f32 to vector<16x128xf32>
    %7 = arith.maximumf %5, %6 : vector<16x128xf32>
    %c0_6 = arith.constant 0 : index
    %c0_7 = arith.constant 0 : index
    %8 = vector.load %arg3[%c0_6, %c0_7] : memref<128x128xf32, #tpu.memory_space<vmem>>, vector<128x128xf32>
    %cst_8 = arith.constant dense<0.000000e+00> : vector<16x128xf32>
    %9 = tpu.matmul %7, %8, %cst_8 {dimension_numbers = #tpu.dot_dimension_numbers<[1], [0], [0], [1], [0, 0, 1, 1], [], []>} : vector<16x128xf32>, vector<128x128xf32>, vector<16x128xf32> -> vector<16x128xf32>
    %c0_9 = arith.constant 0 : index
    %c0_10 = arith.constant 0 : index
    %10 = vector.load %arg4[%c0_9, %c0_10] : memref<1x128xf32, #tpu.memory_space<vmem>>, vector<1x128xf32>
    %11 = vector.broadcast %10 : vector<1x128xf32> to vector<16x128xf32>
    %12 = arith.addf %9, %11 : vector<16x128xf32>
    %c0_11 = arith.constant 0 : index
    %c0_12 = arith.constant 0 : index
    %13 = vector.load %arg5[%c0_11, %c0_12] : memref<16x128xf32, #tpu.memory_space<vmem>>, vector<16x128xf32>
    tpu.vector_store %arg5[%c0_11, %c0_12], %12 {strides = array<i32>} : memref<16x128xf32, #tpu.memory_space<vmem>>, vector<16x128xf32>,
    return
  }
}

</mosaic_0001>

<bundles_post_ra>
// kernel: pgn_forward.1
= control target key start
LH: loop header
LB: loop body
LE: loop exit
PB: predicated region body
PF: predicated region fallthrough
CT: control target
= control target key end

     0   :  { %10 = vsyncpa [#allocation3], 0  ;;  %s465_s0 = inlined_call_operand.hbm [shape: f32[16,32], index: 0, kind: input, shape index: {}]   ;;  %s466_s1 = inlined_call_operand.hbm [shape: f32[32,128], index: 1, kind: input, shape index: {}]   ;;  %s467_s2 = inlined_call_operand.vmem [shape: f32[1,128], index: 2, kind: input, shape index: {}]   ;;  %s468_s3 = inlined_call_operand.hbm [shape: f32[128,128], index: 3, kind: input, shape index: {}]   ;;  %s469_s4 = inlined_call_operand.vmem [shape: f32[1,128], index: 4, kind: input, shape index: {}]   ;;  %s470_s5 = inlined_call_operand.vmem [shape: f32[16,128], index: 5, kind: output, shape index: {}]  }
   0x1   :  { %11 = vsyncpa [#allocation5], 0  ;;  %s407_s18 = smov [#allocation4]   ;;  %s408_s20 = smov [#allocation2]  }
   0x2   :  { %s29_s19 = sshll.u32 %s407_s18, 4  ;;  %s17_s21 = sshll.u32 %s408_s20, 4  ;;  %s30_s19 = int_to_ptr.vmem [resolvable:$true] %s29_s19  ;;  %s18_s21 = int_to_ptr.vmem [resolvable:$true] %s17_s21 }
   0x3   :  { %s351_s22 = scalar_lea.vmem %s30_s19, 512  ;;  %p356_p1 = scmp.lt.s32.totalorder %s30_s19, %s30_s19 }
   0x4   :  { %p352_p0 = scmp.ne.s32.totalorder %s30_s19, %s351_s22  ;;  %p357_p2 = scmp.lt.s32.totalorder %s351_s22, %s351_s22 }
   0x6   :  { %p358_p3 = por %p357_p2, %p356_p1 }
   0x8   :  { %p359_p4 = pnand %p358_p3, %p352_p0 }
   0xa   :  { %362 = shalt.err (!%p359_p4)
}
   0xb   :  { %s409_s23 = smov 128   ;;  %s410_s24 = smov 8  }
   0xc   :  { %35 = dma.hbm_to_vmem [thread:$0]  %s466_s1, 512, %s30_s19, [#allocation5], %s409_s23, %s409_s23, %s410_s24  }
   0xd   :  { %s371_s27 = scalar_lea.vmem %s18_s21, 256  ;;  %p376_p6 = scmp.lt.s32.totalorder %s18_s21, %s18_s21 }
   0xe   :  { %p372_p5 = scmp.ne.s32.totalorder %s18_s21, %s371_s27  ;;  %p377_p7 = scmp.lt.s32.totalorder %s371_s27, %s371_s27 }
  0x10   :  { %p378_p8 = por %p377_p7, %p376_p6 }
  0x12   :  { %p379_p9 = pnand %p378_p8, %p372_p5 }
  0x14   :  { %382 = shalt.err (!%p379_p9)
}
  0x15   :  { %23 = dma.hbm_to_vmem [thread:$0]  %s465_s0, 256, %s18_s21, [#allocation3], %s409_s23, %s409_s23, %s410_s24  }
  0x16   :  { %s411_s30 = smov [#allocation6]  }
  0x17   :  { %s43_s6 = sshll.u32 %s411_s30, 4  ;;  %s44_s6 = int_to_ptr.vmem [resolvable:$true] %s43_s6 }
  0x18   :  { %s391_s7 = scalar_lea.vmem %s44_s6, 2048  ;;  %p396_p11 = scmp.lt.s32.totalorder %s44_s6, %s44_s6 }
  0x19   :  { %p392_p10 = scmp.ne.s32.totalorder %s44_s6, %s391_s7  ;;  %p397_p12 = scmp.lt.s32.totalorder %s391_s7, %s391_s7 }
  0x1b   :  { %p398_p13 = por %p397_p12, %p396_p11 }
  0x1d   :  { %p399_p0 = pnand %p398_p13, %p392_p10 }
  0x1f   :  { %402 = shalt.err (!%p399_p0)
}
  0x20   :  { %49 = dma.hbm_to_vmem [thread:$0]  %s468_s3, 2048, %s44_s6, [#allocation5], %s409_s23, %s409_s23, %s410_s24  }
  0x21   :  { %403 = dma.done.wait [#allocation3], 256  }
  0x22   :  { %404 = vsyncadd [#allocation3], 4294967040 }
  0x23   :  { %405 = dma.done.wait [#allocation5], 2560  }
  0x24   :  { %406 = vsyncadd [#allocation5], 4294964736  ;;  %vm74_vm0 = vcmask 261120   ;;  %v66_v0 = vld [vmem:[#allocation4 + $0x18] sm:$0xff]  ;;  %v65_v1 = vld [vmem:[#allocation4 + $0x10] sm:$0xff] }
  0x25   :  { %292 = vmatprep.subr.mxu0 %v66_v0  ;;  %v61_v2 = vld [vmem:[#allocation2] sm:$0xff]  ;;  %v64_v3 = vld [vmem:[#allocation4 + $0x8] sm:$0xff]  ;;  %v173_v4 = vld [vmem:[#allocation6 + $0x78] sm:$0xff] }
  0x26   :  { %293 = vmatpush3.msra.mxu0 %v66_v0  ;;  %300 = vmatprep.mubr.msk.f32.mxu0 %vm74_vm0, %v61_v2  ;;  %v172_v5 = vld [vmem:[#allocation6 + $0x70] sm:$0xff]  ;;  %v63_v6 = vld [vmem:[#allocation4] sm:$0xff]  ;;  %v171_v7 = vld [vmem:[#allocation6 + $0x68] sm:$0xff] }
  0x27   :  { %294 = vmatprep.subr.mxu0 %v65_v1  ;;  %303 = vmatprep.subr.mxu1 %v173_v4  ;;  %v62_v8 = vld [vmem:[#allocation2 + $0x8] sm:$0xff]  ;;  %v170_v9 = vld [vmem:[#allocation6 + $0x60] sm:$0xff]  ;;  %v168_v11 = vld [vmem:[#allocation6 + $0x50] sm:$0xff] }
  0x28   :  { %295 = vmatpush3.msra.mxu0 %v65_v1  ;;  %304 = vmatpush3.msra.mxu1 %v173_v4  ;;  %v169_v10 = vld [vmem:[#allocation6 + $0x58] sm:$0xff]  ;;  %v167_v12 = vld [vmem:[#allocation6 + $0x48] sm:$0xff]  ;;  %v166_v13 = vld [vmem:[#allocation6 + $0x40] sm:$0xff] }
  0x29   :  { %296 = vmatprep.subr.mxu0 %v64_v3  ;;  %305 = vmatprep.subr.mxu1 %v172_v5  ;;  %v165_v14 = vld [vmem:[#allocation6 + $0x38] sm:$0xff]  ;;  %v164_v15 = vld [vmem:[#allocation6 + $0x30] sm:$0xff]  ;;  %v163_v16 = vld [vmem:[#allocation6 + $0x28] sm:$0xff] }
  0x2a   :  { %297 = vmatpush3.msra.mxu0 %v64_v3  ;;  %306 = vmatpush3.msra.mxu1 %v172_v5  ;;  %v162_v17 = vld [vmem:[#allocation6 + $0x20] sm:$0xff]  ;;  %v161_v18 = vld [vmem:[#allocation6 + $0x18] sm:$0xff]  ;;  %v160_v19 = vld [vmem:[#allocation6 + $0x10] sm:$0xff] }
  0x2b   :  { %298 = vmatprep.subr.mxu0 %v63_v6  ;;  %307 = vmatprep.subr.mxu1 %v171_v7  ;;  %v159_v20 = vld [vmem:[#allocation6 + $0x8] sm:$0xff]  ;;  %v158_v21 = vld [vmem:[#allocation6] sm:$0xff]  ;;  %v264_v22 = vld [vmem:[%s467_s2] ss:$0 sm:$0xff] }
  0x2c   :  { %299 = vmatpush3.msra.mxu0 %v63_v6  ;;  %308 = vmatpush3.msra.mxu1 %v171_v7  ;;  %v267_v29 = vld [vmem:[%s469_s4] ss:$0 sm:$0xff] }
  0x2d   :  { %301 = vmatmul.mubr.msk.f32.vlgmr.msra.gmra.mxu0 %vm74_vm0, %v62_v8  ;;  %309 = vmatprep.subr.mxu1 %v170_v9 }
  0x2e   :  { %310 = vmatpush3.msra.mxu1 %v170_v9 }
  0x2f   :  { %311 = vmatprep.subr.mxu1 %v169_v10 }
  0x30   :  { %312 = vmatpush3.msra.mxu1 %v169_v10 }
  0x31   :  { %313 = vmatprep.subr.mxu1 %v168_v11 }
  0x32   :  { %314 = vmatpush3.msra.mxu1 %v168_v11 }
  0x33   :  { %315 = vmatprep.subr.mxu1 %v167_v12 }
  0x34   :  { %316 = vmatpush3.msra.mxu1 %v167_v12 }
  0x35   :  { %317 = vmatprep.subr.mxu1 %v166_v13 }
  0x36   :  { %318 = vmatpush3.msra.mxu1 %v166_v13 }
  0x37   :  { %319 = vmatprep.subr.mxu1 %v165_v14 }
  0x38   :  { %320 = vmatpush3.msra.mxu1 %v165_v14 }
  0x39   :  { %321 = vmatprep.subr.mxu1 %v164_v15 }
  0x3a   :  { %322 = vmatpush3.msra.mxu1 %v164_v15 }
  0x3b   :  { %323 = vmatprep.subr.mxu1 %v163_v16 }
  0x3c   :  { %324 = vmatpush3.msra.mxu1 %v163_v16 }
  0x3d   :  { %325 = vmatprep.subr.mxu1 %v162_v17 }
  0x3e   :  { %326 = vmatpush3.msra.mxu1 %v162_v17 }
  0x3f   :  { %327 = vmatprep.subr.mxu1 %v161_v18 }
  0x40   :  { %328 = vmatpush3.msra.mxu1 %v161_v18 }
  0x41   :  { %329 = vmatprep.subr.mxu1 %v160_v19 }
  0x42   :  { %330 = vmatpush3.msra.mxu1 %v160_v19 }
  0x43   :  { %331 = vmatprep.subr.mxu1 %v159_v20 }
  0x44   :  { %332 = vmatpush3.msra.mxu1 %v159_v20 }
  0x45   :  { %333 = vmatprep.subr.mxu1 %v158_v21 }
  0x46   :  { %334 = vmatpush3.msra.mxu1 %v158_v21 }
  0xed   :  { %v302_v23 = vpop.f32.mrf.mxu0 }
  0xee   :  { %v153_v24 = vadd.f32 %v302_v23, %v264_v22 }
  0xef   :  { %v147_v25 = vpop.f32.mrf.mxu0 }
  0xf0   :  { %v148_v26 = vadd.f32 %v264_v22, %v147_v25  ;;  %v157_v28 = vmax.f32 %v153_v24, 0.0 }
  0xf2   :  { %v156_v27 = vmax.f32 %v148_v26, 0.0 }
  0xf4   :  { %335 = vmatprep.mubr.f32.mxu1 %v156_v27 }
  0xf5   :  { %336 = vmatmul.mubr.f32.vlgmr.msra.gmra.mxu1 %v157_v28 }
 0x1b5   :  { %v337_v30 = vpop.f32.mrf.mxu1 }
 0x1b6   :  { %v253_v31 = vadd.f32 %v337_v30, %v267_v29 }
 0x1b7   :  { %v247_v32 = vpop.f32.mrf.mxu1 }
 0x1b8   :  { %257 = vst [vmem:[%s470_s5 + $0x8] sm:$0xff] %v253_v31  ;;  %v248_v33 = vadd.f32 %v267_v29, %v247_v32 }
 0x1ba   :  { %256 = vst [vmem:[%s470_s5] sm:$0xff] %v248_v33 }
 0x1bb   :  { %262 = vsyncpa [#allocation3], 1 }
 0x1bc   :  { %263 = vsyncpa [#allocation5], 1 }

</bundles_post_ra>
